<compile_context>
chip_gen: v7x
topology: tpu7x:2x2x1
jax: 0.10.0
libtpu: 0.0.40
codegen_flags: <defaults>
</compile_context>

<pallas_src>
import functools

import numpy as np
import jax
import jax.numpy as jnp
from jax import lax
from jax.experimental import pallas as pl
from jax.experimental.pallas import tpu as pltpu


def _conv_bn_relu_kernel(x_ref, w_ref, bias_ref, o_ref, lhs_ref, *,
                         KH, padding, dilation):
    """Whole batch in one step.

    x_ref:    (N, H, W*Cin)         f32 input rows (unpadded)
    w_ref:    (KH*W*Cin, Wo*Cout)   bf16 band weights (BN scale, KH/KW/Cin
                                    contraction and W zero-padding folded in)
    bias_ref: (1, Wo*Cout)          f32 fused BN bias, tiled over Wo
    o_ref:    (N, Ho, Wo*Cout)      lane-dense output rows
    lhs_ref:  (N, Ho, KH*W*Cin)     bf16 LHS staging scratch (im2row over H only)
    """
    N, H, WC = x_ref.shape
    _, Ho, WoCo = o_ref.shape

    x = x_ref[...].astype(jnp.bfloat16)            # f32 -> bf16 exactly once

    # Build LHS: lane block kh holds input row (ho + kh*dilation - padding);
    # rows falling in the H zero-padding are written as zeros.  All bounds static.
    for kh in range(KH):
        shift = kh * dilation - padding
        lo = max(0, -shift)                        # first output row w/ valid input
        hi = min(Ho, H - shift)                    # one past the last valid row
        lane0, lane1 = kh * WC, (kh + 1) * WC
        if lo > 0:
            lhs_ref[:, 0:lo, lane0:lane1] = jnp.zeros((N, lo, WC), jnp.bfloat16)
        if hi < Ho:
            lhs_ref[:, hi:Ho, lane0:lane1] = jnp.zeros((N, Ho - hi, WC),
                                                       jnp.bfloat16)
        if hi > lo:
            lhs_ref[:, lo:hi, lane0:lane1] = x[:, lo + shift:hi + shift, :]

    # One MXU matmul: (N*Ho, KH*W*Cin) @ (KH*W*Cin, Wo*Cout), f32 accumulation.
    lhs = lhs_ref[...].reshape(N * Ho, KH * WC)
    acc = jnp.dot(lhs, w_ref[...], preferred_element_type=jnp.float32)

    y = jnp.maximum(acc + bias_ref[...], 0.0)      # fused BN bias + ReLU
    o_ref[...] = y.reshape(N, Ho, WoCo).astype(o_ref.dtype)  # unmasked lane-dense store


def _build_band_weights(w_hwio, bn_scale, *, W, Wo, padding, dilation,
                        dtype=jnp.bfloat16):
    """Parameter prep (done once): fold BN scale, the KH/KW/Cin contraction and
    the W zero-padding into one matrix of shape (KH*W*Cin, Wo*Cout)."""
    KH, KW, Cin, Cout = w_hwio.shape
    w = (np.asarray(w_hwio, np.float32)
         * np.asarray(bn_scale, np.float32)[None, None, None, :])
    band = np.zeros((KH, W * Cin, Wo * Cout), np.float32)
    for kh in range(KH):
        for kw in range(KW):
            for wo in range(Wo):
                wi = wo + kw * dilation - padding
                if 0 <= wi < W:                    # taps in the W pad contribute 0
                    band[kh, wi * Cin:(wi + 1) * Cin,
                         wo * Cout:(wo + 1) * Cout] = w[kh, kw]
    return jnp.asarray(band.reshape(KH * W * Cin, Wo * Cout), dtype)


def conv_bn_relu_pallas(x_nhwc, w_hwio, bn_scale, bn_bias, *,
                        padding=1, dilation=1):
    N, H, W, Cin = x_nhwc.shape
    KH, KW, _, Cout = w_hwio.shape
    Ho = H + 2 * padding - dilation * (KH - 1)     # stride=1 (nn.Conv2d default)
    Wo = W + 2 * padding - dilation * (KW - 1)
    assert Ho > 0 and Wo > 0

    band = _build_band_weights(w_hwio, bn_scale, W=W, Wo=Wo,
                               padding=padding, dilation=dilation)
    bias_tiled = jnp.tile(jnp.asarray(bn_bias, jnp.float32),
                          Wo).reshape(1, Wo * Cout)

    # (W, Cin) are adjacent in NHWC -> free reshape onto the lane axis.
    x2d = x_nhwc.reshape(N, H, W * Cin)

    kernel = functools.partial(_conv_bn_relu_kernel,
                               KH=KH, padding=padding, dilation=dilation)

    flops = 2 * (N * Ho) * (KH * W * Cin) * (Wo * Cout)
    bytes_accessed = (x2d.size * x2d.dtype.itemsize
                      + band.size * band.dtype.itemsize
                      + bias_tiled.size * 4
                      + N * Ho * Wo * Cout * x_nhwc.dtype.itemsize)

    # TODO(synk): for production spatial sizes add grid axes over Ho row tiles
    # (tile_h >= 128 rows into M) and Wo column tiles of the band (tile_wo*Cout a
    # multiple of 128 lanes), mark them "parallel" so v7x megacore gets work, keep
    # the grid-invariant band single-buffered (pipeline_mode=pl.Buffered(1)) and
    # set vmem_limit_bytes against v7x's 64 MiB VMEM.  At these toy shapes a
    # single step is fastest (no per-step overhead on v5e/v6e's serial grid).
    out = pl.pallas_call(
        kernel,
        out_shape=jax.ShapeDtypeStruct((N, Ho, Wo * Cout), x_nhwc.dtype),
        scratch_shapes=[pltpu.VMEM((N, Ho, KH * W * Cin), jnp.bfloat16)],
        cost_estimate=pl.CostEstimate(flops=flops, transcendentals=0,
                                      bytes_accessed=bytes_accessed),
    )(x2d, band, bias_tiled)

    return out.reshape(N, Ho, Wo, Cout)


def reference_conv_bn_relu_bf16(x_nhwc, w_hwio, bn_scale, bn_bias, *,
                                padding=1, dilation=1):
    # Mirrors the kernel's BN fold and bf16 operand rounding (f32 accumulation)
    # so the tight-tolerance comparison isolates structural correctness.
    w_folded = (w_hwio.astype(jnp.float32) * bn_scale[None, None, None, :])
    w_folded = w_folded.astype(jnp.bfloat16).astype(jnp.float32)
    xb = x_nhwc.astype(jnp.bfloat16).astype(jnp.float32)
    conv = lax.conv_general_dilated(
        xb, w_folded, window_strides=(1, 1),
        padding=[(padding, padding), (padding, padding)],
        rhs_dilation=(dilation, dilation),
        dimension_numbers=("NHWC", "HWIO", "NHWC"),
        preferred_element_type=jnp.float32)
    return jnp.maximum(conv + bn_bias[None, None, None, :], 0.0)


def reference_conv_bn_relu_f32(x_nhwc, w_hwio, bn_scale, bn_bias, *,
                               padding=1, dilation=1):
    # True f32 reference (no operand rounding) -- looser-tolerance sanity check.
    w_folded = w_hwio.astype(jnp.float32) * bn_scale[None, None, None, :]
    conv = lax.conv_general_dilated(
        x_nhwc.astype(jnp.float32), w_folded, window_strides=(1, 1),
        padding=[(padding, padding), (padding, padding)],
        rhs_dilation=(dilation, dilation),
        dimension_numbers=("NHWC", "HWIO", "NHWC"),
        preferred_element_type=jnp.float32)
    return jnp.maximum(conv + bn_bias[None, None, None, :], 0.0)


if __name__ == "__main__":
    # Module config: ConvBNReLU(in_channels=4, out_channels=8,
    #                           kernel_size=3, padding=1, dilation=1)
    N, Cin, H, W = 2, 4, 16, 16
    Cout, K, padding, dilation = 8, 3, 1, 1
    eps = 1e-5

    key = jax.random.PRNGKey(0)
    kx, kw, kb, kg, kbeta, kmean, kvar = jax.random.split(key, 7)

    # PyTorch-convention input: NCHW
    x_nchw = jax.random.normal(kx, (N, Cin, H, W), dtype=jnp.float32)

    conv_w_oihw = 0.1 * jax.random.normal(kw, (Cout, Cin, K, K), dtype=jnp.float32)
    conv_b = 0.1 * jax.random.normal(kb, (Cout,), dtype=jnp.float32)
    bn_gamma = 1.0 + 0.1 * jax.random.normal(kg, (Cout,), dtype=jnp.float32)
    bn_beta = 0.1 * jax.random.normal(kbeta, (Cout,), dtype=jnp.float32)
    bn_mean = 0.1 * jax.random.normal(kmean, (Cout,), dtype=jnp.float32)
    bn_var = jnp.abs(jax.random.normal(kvar, (Cout,), dtype=jnp.float32)) + 0.5

    # TODO(synk): BatchNorm is eval-mode (running stats); training-mode batch
    # statistics would need a second reduction pass over the conv output.
    fused_scale = bn_gamma / jnp.sqrt(bn_var + eps)
    fused_bias = fused_scale * (conv_b - bn_mean) + bn_beta

    # Layout glue: NCHW -> NHWC, OIHW -> HWIO.
    x_nhwc = jnp.transpose(x_nchw, (0, 2, 3, 1))
    w_hwio = jnp.transpose(conv_w_oihw, (2, 3, 1, 0))

    out_nhwc = conv_bn_relu_pallas(x_nhwc, w_hwio, fused_scale, fused_bias,
                                   padding=padding, dilation=dilation)
    out_nhwc = jax.block_until_ready(out_nhwc)

    ref_bf16 = reference_conv_bn_relu_bf16(x_nhwc, w_hwio, fused_scale, fused_bias,
                                           padding=padding, dilation=dilation)
    ref_f32 = reference_conv_bn_relu_f32(x_nhwc, w_hwio, fused_scale, fused_bias,
                                         padding=padding, dilation=dilation)

    # Back to NCHW to match the PyTorch output convention.
    out_nchw = jnp.transpose(out_nhwc, (0, 3, 1, 2))
    ref_bf16_nchw = jnp.transpose(ref_bf16, (0, 3, 1, 2))
    ref_f32_nchw = jnp.transpose(ref_f32, (0, 3, 1, 2))

    assert out_nchw.shape == (N, Cout, H, W), out_nchw.shape

    # Tight check vs rounding-matched reference (structural correctness).
    err_tight = float(jnp.max(jnp.abs(out_nchw - ref_bf16_nchw)))
    assert jnp.allclose(out_nchw, ref_bf16_nchw, atol=2e-3, rtol=2e-3), err_tight

    # Loose check vs unrounded f32 reference (catches precision regressions).
    err_loose = float(jnp.max(jnp.abs(out_nchw - ref_f32_nchw)))
    assert jnp.allclose(out_nchw, ref_f32_nchw, atol=7.5e-2, rtol=7.5e-2), err_loose

    print("KERNEL_OK")
</pallas_src>

<mosaic_0001>
module attributes {stable_mosaic.version = 11 : i64} {
  func.func @_conv_bn_relu_kernel(%arg0: memref<2x16x64xf32, #tpu.memory_space<vmem>>, %arg1: memref<192x128xbf16, #tpu.memory_space<vmem>>, %arg2: memref<1x128xf32, #tpu.memory_space<vmem>>, %arg3: memref<2x16x128xf32, #tpu.memory_space<vmem>>, %arg4: memref<2x16x192xbf16, #tpu.memory_space<vmem>>) attributes {dimension_semantics = [], scalar_prefetch = 0 : i64, scratch_operands = 1 : i64, tpu.core_type = #tpu.core_type<tc>} {
    %c0 = arith.constant 0 : index
    %c0_0 = arith.constant 0 : index
    %c0_1 = arith.constant 0 : index
    %0 = vector.load %arg0[%c0, %c0_0, %c0_1] : memref<2x16x64xf32, #tpu.memory_space<vmem>>, vector<2x16x64xf32>
    %1 = arith.truncf %0 : vector<2x16x64xf32> to vector<2x16x64xbf16>
    %cst = arith.constant 0.000000e+00 : bf16
    %2 = vector.broadcast %cst : bf16 to vector<2x1x64xbf16>
    %c0_2 = arith.constant 0 : index
    %c0_3 = arith.constant 0 : index
    %c0_4 = arith.constant 0 : index
    %3 = vector.load %arg4[%c0_2, %c0_3, %c0_4] : memref<2x16x192xbf16, #tpu.memory_space<vmem>>, vector<2x1x64xbf16>
    tpu.vector_store %arg4[%c0_2, %c0_3, %c0_4], %2 {strides = array<i32>} : memref<2x16x192xbf16, #tpu.memory_space<vmem>>, vector<2x1x64xbf16>,
    %4 = vector.extract_strided_slice %1 {offsets = [0, 0, 0], sizes = [2, 15, 64], strides = [1, 1, 1]} : vector<2x16x64xbf16> to vector<2x15x64xbf16>
    %c0_5 = arith.constant 0 : index
    %c1 = arith.constant 1 : index
    %c0_6 = arith.constant 0 : index
    %5 = vector.load %arg4[%c0_5, %c1, %c0_6] : memref<2x16x192xbf16, #tpu.memory_space<vmem>>, vector<2x15x64xbf16>
    tpu.vector_store %arg4[%c0_5, %c1, %c0_6], %4 {strides = array<i32>} : memref<2x16x192xbf16, #tpu.memory_space<vmem>>, vector<2x15x64xbf16>,
    %c0_7 = arith.constant 0 : index
    %c0_8 = arith.constant 0 : index
    %c64 = arith.constant 64 : index
    %6 = vector.load %arg4[%c0_7, %c0_8, %c64] : memref<2x16x192xbf16, #tpu.memory_space<vmem>>, vector<2x16x64xbf16>
    tpu.vector_store %arg4[%c0_7, %c0_8, %c64], %1 {strides = array<i32>} : memref<2x16x192xbf16, #tpu.memory_space<vmem>>, vector<2x16x64xbf16>,
    %cst_9 = arith.constant 0.000000e+00 : bf16
    %7 = vector.broadcast %cst_9 : bf16 to vector<2x1x64xbf16>
    %c0_10 = arith.constant 0 : index
    %c15 = arith.constant 15 : index
    %c128 = arith.constant 128 : index
    %8 = vector.load %arg4[%c0_10, %c15, %c128] : memref<2x16x192xbf16, #tpu.memory_space<vmem>>, vector<2x1x64xbf16>
    tpu.vector_store %arg4[%c0_10, %c15, %c128], %7 {strides = array<i32>} : memref<2x16x192xbf16, #tpu.memory_space<vmem>>, vector<2x1x64xbf16>,
    %9 = vector.extract_strided_slice %1 {offsets = [0, 1, 0], sizes = [2, 15, 64], strides = [1, 1, 1]} : vector<2x16x64xbf16> to vector<2x15x64xbf16>
    %c0_11 = arith.constant 0 : index
    %c0_12 = arith.constant 0 : index
    %c128_13 = arith.constant 128 : index
    %10 = vector.load %arg4[%c0_11, %c0_12, %c128_13] : memref<2x16x192xbf16, #tpu.memory_space<vmem>>, vector<2x15x64xbf16>
    tpu.vector_store %arg4[%c0_11, %c0_12, %c128_13], %9 {strides = array<i32>} : memref<2x16x192xbf16, #tpu.memory_space<vmem>>, vector<2x15x64xbf16>,
    %c0_14 = arith.constant 0 : index
    %c0_15 = arith.constant 0 : index
    %c0_16 = arith.constant 0 : index
    %11 = vector.load %arg4[%c0_14, %c0_15, %c0_16] : memref<2x16x192xbf16, #tpu.memory_space<vmem>>, vector<2x16x192xbf16>
    %12 = vector.shape_cast %11 : vector<2x16x192xbf16> to vector<32x192xbf16>
    %c0_17 = arith.constant 0 : index
    %c0_18 = arith.constant 0 : index
    %13 = vector.load %arg1[%c0_17, %c0_18] : memref<192x128xbf16, #tpu.memory_space<vmem>>, vector<192x128xbf16>
    %cst_19 = arith.constant dense<0.000000e+00> : vector<32x128xf32>
    %14 = tpu.matmul %12, %13, %cst_19 {dimension_numbers = #tpu.dot_dimension_numbers<[1], [0], [0], [1], [0, 0, 1, 1], [], []>} : vector<32x192xbf16>, vector<192x128xbf16>, vector<32x128xf32> -> vector<32x128xf32>
    %c0_20 = arith.constant 0 : index
    %c0_21 = arith.constant 0 : index
    %15 = vector.load %arg2[%c0_20, %c0_21] : memref<1x128xf32, #tpu.memory_space<vmem>>, vector<1x128xf32>
    %16 = vector.broadcast %15 : vector<1x128xf32> to vector<32x128xf32>
    %17 = arith.addf %14, %16 : vector<32x128xf32>
    %cst_22 = arith.constant 0.000000e+00 : f32
    %18 = vector.broadcast %cst_22 : f32 to vector<32x128xf32>
    %19 = arith.maximumf %17, %18 : vector<32x128xf32>
    %20 = vector.shape_cast %19 : vector<32x128xf32> to vector<2x16x128xf32>
    %c0_23 = arith.constant 0 : index
    %c0_24 = arith.constant 0 : index
    %c0_25 = arith.constant 0 : index
    %21 = vector.load %arg3[%c0_23, %c0_24, %c0_25] : memref<2x16x128xf32, #tpu.memory_space<vmem>>, vector<2x16x128xf32>
    tpu.vector_store %arg3[%c0_23, %c0_24, %c0_25], %20 {strides = array<i32>} : memref<2x16x128xf32, #tpu.memory_space<vmem>>, vector<2x16x128xf32>,
    return
  }
}

</mosaic_0001>

<bundles_post_ra>
// kernel: tpu_custom_call.1
= control target key start
LH: loop header
LB: loop body
LE: loop exit
PB: predicated region body
PF: predicated region fallthrough
CT: control target
= control target key end

     0   :  { %8 = vsyncpa [#allocation4], 0  ;;  %s563_s0 = inlined_call_operand.hbm [shape: f32[2,16,64], index: 0, kind: input, shape index: {}]   ;;  %s564_s1 = inlined_call_operand.hbm [shape: bf16[192,128], index: 1, kind: input, shape index: {}]   ;;  %s565_s2 = inlined_call_operand.vmem [shape: f32[1,128], index: 2, kind: input, shape index: {}]   ;;  %s566_s3 = inlined_call_operand.hbm [shape: f32[2,16,128], index: 3, kind: output, shape index: {}]  }
   0x1   :  { %9 = vsyncpa [#allocation7], 0 }
   0x2   :  { %10 = vsyncpa [#allocation5], 0  ;;  %s438_s12 = smov [#allocation3]   ;;  %s366_s16 = scalar_lea.hbm %s563_s0, 512 }
   0x3   :  { %s16_s13 = sshll.u32 %s438_s12, 4  ;;  %p367_p0 = scmp.ne.s32.totalorder %s563_s0, %s366_s16  ;;  %s17_s13 = int_to_ptr.vmem [resolvable:$true] %s16_s13 }
   0x4   :  { %p370_p1 = scmp.lt.u32.totalorder %s366_s16, %s563_s0 }
   0x6   :  { %p372_p2 = pnand %p370_p1, %p367_p0 }
   0x8   :  { %375 = shalt.err (!%p372_p2)
}
   0x9   :  { %s376_s21 = scalar_lea.vmem %s17_s13, 512  ;;  %p381_p4 = scmp.lt.s32.totalorder %s17_s13, %s17_s13 }
   0xa   :  { %p377_p3 = scmp.ne.s32.totalorder %s17_s13, %s376_s21  ;;  %p382_p5 = scmp.lt.s32.totalorder %s376_s21, %s376_s21 }
   0xc   :  { %p383_p6 = por %p382_p5, %p381_p4 }
   0xe   :  { %p384_p7 = pnand %p383_p6, %p377_p3 }
  0x10   :  { %387 = shalt.err (!%p384_p7)
}
  0x11   :  { %s439_s22 = smov 128   ;;  %s440_s23 = smov 8  }
  0x12   :  { %22 = dma.hbm_to_vmem [thread:$0]  %s563_s0, 512, %s17_s13, [#allocation4], %s439_s22, %s439_s22, %s440_s23  }
  0x13   :  { %s441_s26 = smov [#allocation6]   ;;  %s388_s30 = scalar_lea.hbm %s564_s1, 1536 }
  0x14   :  { %s28_s27 = sshll.u32 %s441_s26, 4  ;;  %p389_p8 = scmp.ne.s32.totalorder %s564_s1, %s388_s30  ;;  %s29_s27 = int_to_ptr.vmem [resolvable:$true] %s28_s27 }
  0x15   :  { %p392_p9 = scmp.lt.u32.totalorder %s388_s30, %s564_s1 }
  0x17   :  { %p394_p10 = pnand %p392_p9, %p389_p8 }
  0x19   :  { %397 = shalt.err (!%p394_p10)
}
  0x1a   :  { %s398_s8 = scalar_lea.vmem %s29_s27, 1536  ;;  %p403_p12 = scmp.lt.s32.totalorder %s29_s27, %s29_s27 }
  0x1b   :  { %p399_p11 = scmp.ne.s32.totalorder %s29_s27, %s398_s8  ;;  %p404_p13 = scmp.lt.s32.totalorder %s398_s8, %s398_s8 }
  0x1d   :  { %p405_p0 = por %p404_p13, %p403_p12 }
  0x1f   :  { %p406_p1 = pnand %p405_p0, %p399_p11 }
  0x21   :  { %409 = shalt.err (!%p406_p1)
}
  0x22   :  { %s442_s0 = smov 64   ;;  %s443_s9 = smov 4  }
  0x23   :  { %34 = dma.hbm_to_vmem [thread:$0]  %s564_s1, 1536, %s29_s27, [#allocation7], %s442_s0, %s442_s0, %s443_s9  }
  0x24   :  { %432 = dma.done.wait [#allocation4], 512  }
  0x25   :  { %433 = vsyncadd [#allocation4], 4294966784 }
  0x26   :  { %434 = dma.done.wait [#allocation7], 1536  }
  0x27   :  { %435 = vsyncadd [#allocation7], 4294965760  ;;  %v444_v0 = vmov 0   ;;  %v44_v1 = vld [vmem:[#allocation3] sm:$0xff]  ;;  %v45_v2 = vld [vmem:[#allocation3 + $0x8] sm:$0xff]  ;;  %vm50_vm0 = vcmask 516096  }
  0x28   :  { %232 = vmatprep.subr.bf16.mxu0 %v444_v0  ;;  %322 = vmatprep.subr.bf16.mxu1 %v444_v0  ;;  %v46_v3 = vld [vmem:[#allocation3 + $0x10] sm:$0xff]  ;;  %v48_v4 = vpack.c.bf16 %v45_v2, %v44_v1  ;;  %v47_v5 = vld [vmem:[#allocation3 + $0x18] sm:$0xff]  ;;  %v354_v6 = vld [vmem:[#allocation6] sm:$0xff]   ;;  %vm51_vm1 = vsmask.f32 256  ;;  %vm95_vm2 = vcmask 523271  }
  0x29   :  { %v49_v7 = vpack.c.bf16 %v47_v5, %v46_v3  ;;  %233 = vmatpush1.bf16.msra.mxu0 %v354_v6  ;;  %334 = vmatpush1.bf16.msra.mxu1 %v354_v6  ;;  %v355_v8 = vld [vmem:[#allocation6 + $0x8] sm:$0xff]   ;;  %vm96_vm3 = vsmask.f32 7966  ;;  %v356_v10 = vld [vmem:[#allocation6 + $0x10] sm:$0xff]   ;;  %vm499_vm4 = vmand %vm50_vm0, %vm51_vm1  ;;  %vm75_vm6 = vcmask 523264   ;;  %vm92_vm11 = vcmask 1048064  }
  0x2a   :  { %86 = vrot.lane.b32.xlu0 %v48_v4, %s442_s0  ;;  %234 = vmatprep.subr.bf16.mxu0 %v444_v0  ;;  %v60_v9 = vshrl.u32 %v48_v4, 16  ;;  %v63_v11 = vshll.u32 %v48_v4, 16  ;;  %vm503_vm5 = vmand %vm95_vm2, %vm96_vm3  ;;  %v357_v18 = vld [vmem:[#allocation6 + $0x18] sm:$0xff]   ;;  %v53_v19 = vld [vmem:[#allocation2] sm:$0x1]  ;;  %s445_s13 = smov [#allocation8]  }
  0x2b   :  { %323 = vmatprep.subr.bf16.mxu1 %v444_v0  ;;  %v67_v12 = vshrl.u32 %v49_v7, 16  ;;  %v70_v15 = vshll.u32 %v49_v7, 16  ;;  %v98_v20 = vld [vmem:[#allocation2 + $0x8] sm:$0x80]  ;;  %v101_v21 = vld [vmem:[#allocation2 + $0x18] sm:$0x80] }
  0x2c   :  { %v62_v14 = vrot.slane %v60_v9, 7  ;;  %v104_v17 = vrot.slane %v63_v11, 1  ;;  %v54_v23 = vsel %vm499_vm4, 0, %v53_v19  ;;  %v99_v24 = vsel %vm503_vm5, 0, %v98_v20  ;;  %v56_v26 = vld [vmem:[#allocation2 + $0x10] sm:$0x1] }
  0x2d   :  { %235 = vmatpush1.bf16.msra.mxu0 %v355_v8  ;;  %335 = vmatpush1.bf16.msra.mxu1 %v355_v8  ;;  %v106_v22 = vrot.slane %v70_v15, 1  ;;  %v102_v25 = vsel %vm503_vm5, 0, %v101_v21  ;;  %55 = vst [vmem:[#allocation2] sm:$0x1] %v54_v23  ;;  %100 = vst [vmem:[#allocation2 + $0x8] sm:$0x80] %v99_v24 }
  0x2e   :  { %88 = vrot.lane.b32.xlu0 %v49_v7, %s442_s0  ;;  %236 = vmatprep.subr.bf16.mxu0 %v444_v0  ;;  %103 = vst [vmem:[#allocation2 + $0x18] sm:$0x80] %v102_v25  ;;  %vm76_vm7 = vsmask.f32 7938  ;;  %v57_v27 = vsel %vm499_vm4, 0, %v56_v26  ;;  %v69_v28 = vrot.slane %v67_v12, 7  ;;  %v65_v30 = vor.u32 %v63_v11, %v62_v14 }
  0x2f   :  { %324 = vmatprep.subr.bf16.mxu1 %v444_v0  ;;  %v358_v29 = vld [vmem:[#allocation6 + $0x20] sm:$0xff]   ;;  %vm110_vm8 = vsmask.f32 7424  ;;  %58 = vst [vmem:[#allocation2 + $0x10] sm:$0x1] %v57_v27  ;;  %v105_v31 = vor.u32 %v104_v17, %v60_v9  ;;  %v107_v32 = vor.u32 %v106_v22, %v67_v12  ;;  %vm520_vm9 = vmand %vm75_vm6, %vm76_vm7  ;;  %v359_v35 = vld [vmem:[#allocation6 + $0x28] sm:$0xff]  }
  0x30   :  { %vm111_vm10 = vmand %vm75_vm6, %vm110_vm8  ;;  %v72_v34 = vor.u32 %v70_v15, %v69_v28  ;;  %v360_v43 = vld [vmem:[#allocation6 + $0x30] sm:$0xff]   ;;  %v361_v45 = vld [vmem:[#allocation6 + $0x38] sm:$0xff]   ;;  %s294_s14 = sshll.u32 %s445_s13, 4  ;;  %s295_s14 = int_to_ptr.vmem [resolvable:$true] %s294_s14 }
  0x31   :  { %237 = vmatpush1.bf16.msra.mxu0 %v356_v10  ;;  %336 = vmatpush1.bf16.msra.mxu1 %v356_v10  ;;  %v362_v46 = vld [vmem:[#allocation6 + $0x40] sm:$0xff]   ;;  %v363_v47 = vld [vmem:[#allocation6 + $0x48] sm:$0xff]   ;;  %v364_v48 = vld [vmem:[#allocation6 + $0x50] sm:$0xff]   ;;  %p415_p3 = scmp.lt.s32.totalorder %s295_s14, %s295_s14 }
  0x32   :  { %238 = vmatprep.subr.bf16.mxu0 %v444_v0  ;;  %325 = vmatprep.subr.bf16.mxu1 %v444_v0  ;;  %v365_v49 = vld [vmem:[#allocation6 + $0x58] sm:$0xff]   ;;  %v307_v54 = vld [vmem:[%s565_s2] ss:$0 sm:$0xff]  ;;  %s410_s2 = scalar_lea.vmem %s295_s14, 512 }
  0x33   :  { %p411_p2 = scmp.ne.s32.totalorder %s295_s14, %s410_s2  ;;  %p416_p4 = scmp.lt.s32.totalorder %s410_s2, %s410_s2 }
  0x34   :  { %v78_v36 = vld [vmem:[#allocation2] sm:$0xff]  ;;  %v112_v37 = vld [vmem:[#allocation2 + $0x8] sm:$0xff] }
  0x35   :  { %239 = vmatpush1.bf16.msra.mxu0 %v357_v18  ;;  %337 = vmatpush1.bf16.msra.mxu1 %v357_v18  ;;  %v115_v38 = vld [vmem:[#allocation2 + $0x18] sm:$0xff]  ;;  %v79_v40 = vsel %vm520_vm9, %v65_v30, %v78_v36  ;;  %v113_v41 = vsel %vm111_vm10, %v105_v31, %v112_v37  ;;  %p417_p5 = por %p416_p4, %p415_p3 }
  0x36   :  { %240 = vmatprep.subr.bf16.mxu0 %v444_v0  ;;  %326 = vmatprep.subr.bf16.mxu1 %v444_v0  ;;  %v116_v39 = vsel %vm111_vm10, %v107_v32, %v115_v38  ;;  %80 = vst [vmem:[#allocation2] sm:$0xff] %v79_v40  ;;  %114 = vst [vmem:[#allocation2 + $0x8] sm:$0xff] %v113_v41  ;;  %v81_v42 = vld [vmem:[#allocation2 + $0x10] sm:$0xff] }
  0x37   :  { %117 = vst [vmem:[#allocation2 + $0x18] sm:$0xff] %v116_v39  ;;  %320 = vmatprep.mubr.msk.bf16.mxu0 %vm75_vm6, %v113_v41  ;;  %321 = vmatprep.mubr.msk.bf16.mxu1 %vm75_vm6, %v116_v39  ;;  %v82_v44 = vsel %vm520_vm9, %v72_v34, %v81_v42  ;;  %p418_p6 = pnand %p417_p5, %p411_p2 }
  0x38   :  { %83 = vst [vmem:[#allocation2 + $0x10] sm:$0xff] %v82_v44 }
  0x39   :  { %241 = vmatpush1.bf16.msra.mxu0 %v358_v29  ;;  %338 = vmatpush1.bf16.msra.mxu1 %v358_v29 }
  0x3a   :  { %242 = vmatprep.subr.bf16.mxu0 %v444_v0  ;;  %327 = vmatprep.subr.bf16.mxu1 %v444_v0 }
  0x3d   :  { %243 = vmatpush1.bf16.msra.mxu0 %v359_v35  ;;  %339 = vmatpush1.bf16.msra.mxu1 %v359_v35 }
  0x3e   :  { %244 = vmatprep.subr.bf16.mxu0 %v444_v0  ;;  %328 = vmatprep.subr.bf16.mxu1 %v444_v0 }
  0x41   :  { %245 = vmatpush1.bf16.msra.mxu0 %v360_v43  ;;  %340 = vmatpush1.bf16.msra.mxu1 %v360_v43 }
  0x42   :  { %246 = vmatprep.subr.bf16.mxu0 %v444_v0  ;;  %329 = vmatprep.subr.bf16.mxu1 %v444_v0 }
  0x45   :  { %247 = vmatpush1.bf16.msra.mxu0 %v361_v45  ;;  %341 = vmatpush1.bf16.msra.mxu1 %v361_v45 }
  0x46   :  { %248 = vmatprep.subr.bf16.mxu0 %v444_v0  ;;  %330 = vmatprep.subr.bf16.mxu1 %v444_v0 }
  0x49   :  { %249 = vmatpush1.bf16.msra.mxu0 %v362_v46  ;;  %342 = vmatpush1.bf16.msra.mxu1 %v362_v46 }
  0x4a   :  { %250 = vmatprep.subr.bf16.mxu0 %v444_v0  ;;  %331 = vmatprep.subr.bf16.mxu1 %v444_v0 }
  0x4d   :  { %251 = vmatpush1.bf16.msra.mxu0 %v363_v47  ;;  %343 = vmatpush1.bf16.msra.mxu1 %v363_v47 }
  0x4e   :  { %252 = vmatprep.subr.bf16.mxu0 %v444_v0  ;;  %332 = vmatprep.subr.bf16.mxu1 %v444_v0 }
  0x51   :  { %253 = vmatpush1.bf16.msra.mxu0 %v364_v48  ;;  %344 = vmatpush1.bf16.msra.mxu1 %v364_v48 }
  0x52   :  { %254 = vmatprep.subr.bf16.mxu0 %v444_v0  ;;  %333 = vmatprep.subr.bf16.mxu1 %v444_v0 }
  0x55   :  { %255 = vmatpush1.bf16.msra.mxu0 %v365_v49  ;;  %345 = vmatpush1.bf16.msra.mxu1 %v365_v49 }
  0x9c   :  { %v87_v50 = vpop.permute.xlu0 %86 }
  0x9d   :  { %93 = vst.msk [vmem:[#allocation2] sm:$0xff] %vm92_vm11, %v87_v50 }
  0xa0   :  { %v89_v51 = vpop.permute.xlu0 %88 }
  0xa1   :  { %94 = vst.msk [vmem:[#allocation2 + $0x10] sm:$0xff] %vm92_vm11, %v89_v51 }
  0xa4   :  { %v118_v52 = vld [vmem:[#allocation2] sm:$0xff] }
  0xa5   :  { %265 = vmatmul.mubr.bf16.vlgmr.msra.gmra.mrb[0].mxu0 %v118_v52 }
  0xa8   :  { %v120_v53 = vld [vmem:[#allocation2 + $0x10] sm:$0xff] }
  0xa9   :  { %273 = vmatmul.mubr.bf16.vlgmr.msra.gmra.mrb[0].mxu1 %v120_v53 }
 0x178   :  { %v266_v55 = vpop.f32.mrb[0].mxu0 }
 0x179   :  { %v267_v56 = vadd.f32 %v307_v54, %v266_v55  ;;  %v268_v57 = vpop.f32.mrb[1].mxu0 }
 0x17a   :  { %v269_v58 = vpop.f32.mrb[2].mxu0 }
 0x17b   :  { %v281_v59 = vmax.f32 %v267_v56, 0.0  ;;  %v270_v60 = vadd.f32 %v307_v54, %v269_v58  ;;  %v271_v61 = vpop.f32.mrb[3].mxu0 }
 0x17c   :  { %v274_v62 = vpop.f32.mrb[0].mxu1 }
 0x17d   :  { %285 = vst [vmem:[#allocation8] sm:$0xff] %v281_v59  ;;  %v282_v63 = vmax.f32 %v270_v60, 0.0  ;;  %v275_v0 = vadd.f32 %v307_v54, %v274_v62  ;;  %v276_v1 = vpop.f32.mrb[1].mxu1 }
 0x17e   :  { %v277_v2 = vpop.f32.mrb[2].mxu1 }
 0x17f   :  { %286 = vst [vmem:[#allocation8 + $0x8] sm:$0xff] %v282_v63  ;;  %v283_v3 = vmax.f32 %v275_v0, 0.0  ;;  %v278_v4 = vadd.f32 %v307_v54, %v277_v2  ;;  %v279_v5 = vpop.f32.mrb[3].mxu1 }
 0x181   :  { %287 = vst [vmem:[#allocation8 + $0x10] sm:$0xff] %v283_v3  ;;  %v284_v6 = vmax.f32 %v278_v4, 0.0 }
 0x183   :  { %288 = vst [vmem:[#allocation8 + $0x18] sm:$0xff] %v284_v6 }
 0x184   :  { %421 = shalt.err (!%p418_p6)
}
 0x185   :  { %s422_s17 = scalar_lea.hbm %s566_s3, 512 }
 0x186   :  { %p423_p7 = scmp.ne.s32.totalorder %s566_s3, %s422_s17  ;;  %p426_p8 = scmp.lt.u32.totalorder %s422_s17, %s566_s3 }
 0x188   :  { %p428_p9 = pnand %p426_p8, %p423_p7 }
 0x18a   :  { %431 = shalt.err (!%p428_p9)
}
 0x18b   :  { %300 = dma.vmem_to_hbm [thread:$0]  %s295_s14, 512, %s566_s3, [#allocation5], %s439_s22, %s439_s22, %s440_s23  }
 0x18c   :  { %436 = dma.done.wait [#allocation5], 512  }
 0x18d   :  { %437 = vsyncadd [#allocation5], 4294966784 }
 0x18e   :  { %304 = vsyncpa [#allocation4], 1 }
 0x18f   :  { %305 = vsyncpa [#allocation7], 1 }
 0x190   :  { %306 = vsyncpa [#allocation5], 1 }

</bundles_post_ra>
